<compile_context>
chip_gen: v7x
topology: tpu7x:2x2x1
jax: 0.10.0
libtpu: 0.0.40
codegen_flags: <defaults>
</compile_context>

<pallas_src>
import functools

import numpy as np

import jax
import jax.numpy as jnp
from jax.experimental import pallas as pl
from jax.experimental.pallas import tpu as pltpu


def _loss_kernel(scale_ref, slab_ref, out_ref, *, rows, bounds):
    """slab_ref: [2*rows, W] f32 (GT rows 0..rows-1, PRED rows rows..2*rows-1).

    scale_ref: SMEM f32[2] = (lamda_coord, lamda_noobj)
    out_ref:   SMEM f32[8] = (total, coord, obj_conf, noobj_conf, class, 0,0,0)
    bounds:    static per-term lane boundaries (7 Python ints).
    """
    W = slab_ref.shape[1]
    full = slab_ref[...]                                   # [2*rows, W]

    # Lane-range masks from static boundaries (VPU only, no extra inputs).
    lane = jax.lax.broadcasted_iota(jnp.int32, (1, W), 1)  # [1, W]
    sqrt_mask = (lane >= bounds[1]) & (lane < bounds[2])   # coord w/h lanes
    coord_mask = lane < bounds[2]                          # coord x/y + w/h
    class_mask = (lane >= bounds[2]) & (lane < bounds[3])
    obj_mask = (lane >= bounds[3]) & (lane < bounds[4])
    noobj_mask = (lane >= bounds[4]) & (lane < bounds[6])

    # sqrt only on the w/h lanes; guard the other lanes so sqrt(x<0) never
    # appears (forward identical, gradient-safe).  One EUP pass over the slab.
    safe = jnp.where(sqrt_mask, full, 1.0)
    tr = jnp.where(sqrt_mask, jnp.sqrt(safe), full)        # [2*rows, W]

    # Single squared-difference pass (sublane slice at an 8-aligned boundary).
    d = tr[:rows, :] - tr[rows:, :]                        # [rows, W]
    sq = d * d

    # One data reduction: collapse sublanes to a single per-lane row.
    per_lane = jnp.sum(sq, axis=0, keepdims=True)          # [1, W]

    # Four grouped cross-lane reductions (terms sharing a weight are fused).
    r_coord = jnp.sum(jnp.where(coord_mask, per_lane, 0.0))
    r_class = jnp.sum(jnp.where(class_mask, per_lane, 0.0))
    r_obj = jnp.sum(jnp.where(obj_mask, per_lane, 0.0))
    r_noobj = jnp.sum(jnp.where(noobj_mask, per_lane, 0.0))

    lamda_coord = scale_ref[0]
    lamda_noobj = scale_ref[1]

    coord_loss = lamda_coord * r_coord
    class_loss = r_class
    obj_conf_loss = r_obj
    noobj_conf_loss = lamda_noobj * r_noobj
    total_loss = coord_loss + obj_conf_loss + noobj_conf_loss + class_loss

    out_ref[0] = total_loss
    out_ref[1] = coord_loss
    out_ref[2] = obj_conf_loss
    out_ref[3] = noobj_conf_loss
    out_ref[4] = class_loss
    out_ref[5] = 0.0
    out_ref[6] = 0.0
    out_ref[7] = 0.0


def _layout(sizes):
    """Choose (rows, width) so every term owns a contiguous block of lanes."""
    def lanes_needed(rows):
        return sum(-(-n // rows) for n in sizes)

    rows = 8
    while lanes_needed(rows) > 128 and rows < (1 << 20):
        rows *= 2
    width = max(128, -(-lanes_needed(rows) // 128) * 128)
    return rows, width


def _lane_bounds(sizes, rows):
    bounds = [0]
    for n in sizes:
        bounds.append(bounds[-1] + (-(-n // rows)))
    return tuple(bounds)


def _pack_side(terms, rows):
    """Pack flat terms row-major (no transpose) into a [rows, lanes] slab."""
    cols = []
    for term in terms:
        flat = jnp.reshape(term, (-1,))
        if flat.dtype != jnp.float32:
            flat = flat.astype(jnp.float32)
        n = flat.shape[0]
        lanes = -(-n // rows)
        pad = lanes * rows - n
        if pad:
            flat = jnp.pad(flat, (0, pad))
        cols.append(jnp.reshape(flat, (rows, lanes)))
    return jnp.concatenate(cols, axis=1)


def yolo_loss(lamda_coord, lamda_noobj,
              obj_coord_gt, obj_class_gt, obj_conf_gt,
              noobj_conf_gt_1, noobj_conf_gt_2,
              obj_model_output_coord, obj_model_output_class,
              obj_model_output_conf,
              noobj_model_output_conf_1, noobj_model_output_conf_2):
    gt_terms = (obj_coord_gt[:, :2], obj_coord_gt[:, 2:], obj_class_gt,
                obj_conf_gt, noobj_conf_gt_1, noobj_conf_gt_2)
    pr_terms = (obj_model_output_coord[:, :2], obj_model_output_coord[:, 2:],
                obj_model_output_class, obj_model_output_conf,
                noobj_model_output_conf_1, noobj_model_output_conf_2)

    sizes = tuple(int(np.prod(t.shape)) for t in gt_terms)
    rows, width = _layout(sizes)
    bounds = _lane_bounds(sizes, rows)

    # One slab: GT rows stacked over PRED rows, single lane-pad at the end.
    gt_side = _pack_side(gt_terms, rows)                 # [rows, lanes_total]
    pr_side = _pack_side(pr_terms, rows)                 # [rows, lanes_total]
    slab = jnp.concatenate([gt_side, pr_side], axis=0)   # [2*rows, lanes_total]
    lanes_total = slab.shape[1]
    if lanes_total < width:
        slab = jnp.pad(slab, ((0, 0), (0, width - lanes_total)))

    scales = jnp.array([lamda_coord, lamda_noobj], dtype=jnp.float32)

    kernel = functools.partial(_loss_kernel, rows=rows, bounds=bounds)
    out = pl.pallas_call(
        kernel,
        out_shape=jax.ShapeDtypeStruct((8,), jnp.float32),
        in_specs=[
            pl.BlockSpec(memory_space=pltpu.MemorySpace.SMEM),   # lamdas
            pl.BlockSpec(memory_space=pltpu.MemorySpace.VMEM),   # packed slab
        ],
        out_specs=pl.BlockSpec(memory_space=pltpu.MemorySpace.SMEM),
    )(scales, slab)

    # (total_loss, coord_loss, obj_conf_loss, noobj_conf_loss, class_loss)
    return out[0], out[1], out[2], out[3], out[4]


def _reference(lamda_coord, lamda_noobj, cg, kg, fg, n1g, n2g, cp, kp, fp,
               n1p, n2p):
    coord_c = lamda_coord * jnp.sum((cg[:, :2] - cp[:, :2]) ** 2)
    coord_wh = lamda_coord * jnp.sum(
        (jnp.sqrt(cg[:, 2:]) - jnp.sqrt(cp[:, 2:])) ** 2)
    coord = coord_c + coord_wh
    cls = jnp.sum((kg - kp) ** 2)
    objc = jnp.sum((fg - fp) ** 2)
    no1 = lamda_noobj * jnp.sum((n1g - n1p) ** 2)
    no2 = lamda_noobj * jnp.sum((n2g - n2p) ** 2)
    noc = no1 + no2
    return coord + objc + noc + cls, coord, objc, noc, cls


if __name__ == "__main__":
    # Loss(lamda_coord=5.0, lamda_noobj=0.5, B=2, S=4) — small synthetic config
    lamda_coord, lamda_noobj, B, S, C = 5.0, 0.5, 2, 4, 4
    batch = 2
    n_obj = 8                                   # responsible boxes
    n_noobj = batch * S * S * B - n_obj * B     # remaining predictors -> 48

    # TODO(synk): get_part_of_loss body not provided; its extracted outputs are
    # synthesized deterministically here and fed to the kernel.
    key = jax.random.PRNGKey(0)
    ks = jax.random.split(key, 10)
    f32 = jnp.float32
    obj_coord_gt = jax.random.uniform(ks[0], (n_obj, 4), f32, 0.05, 1.0)
    obj_coord_pr = jax.random.uniform(ks[1], (n_obj, 4), f32, 0.05, 1.0)
    obj_class_gt = jax.random.uniform(ks[2], (n_obj, C), f32)
    obj_class_pr = jax.random.uniform(ks[3], (n_obj, C), f32)
    obj_conf_gt = jax.random.uniform(ks[4], (n_obj, 1), f32)
    obj_conf_pr = jax.random.uniform(ks[5], (n_obj, 1), f32)
    noobj_conf_gt_1 = jax.random.uniform(ks[6], (n_noobj, 1), f32)
    noobj_conf_pr_1 = jax.random.uniform(ks[7], (n_noobj, 1), f32)
    noobj_conf_gt_2 = jax.random.uniform(ks[8], (n_noobj, 1), f32)
    noobj_conf_pr_2 = jax.random.uniform(ks[9], (n_noobj, 1), f32)

    loss_fn = jax.jit(yolo_loss)
    result = loss_fn(
        lamda_coord, lamda_noobj,
        obj_coord_gt, obj_class_gt, obj_conf_gt,
        noobj_conf_gt_1, noobj_conf_gt_2,
        obj_coord_pr, obj_class_pr, obj_conf_pr,
        noobj_conf_pr_1, noobj_conf_pr_2)
    result = jax.block_until_ready(result)

    ref = _reference(lamda_coord, lamda_noobj,
                     obj_coord_gt, obj_class_gt, obj_conf_gt,
                     noobj_conf_gt_1, noobj_conf_gt_2,
                     obj_coord_pr, obj_class_pr, obj_conf_pr,
                     noobj_conf_pr_1, noobj_conf_pr_2)

    for got, want in zip(result, ref):
        assert jnp.allclose(got, want, rtol=1e-5, atol=1e-5), (got, want)
    print("KERNEL_OK")
</pallas_src>

<mosaic_0001>
module attributes {stable_mosaic.version = 11 : i64} {
  func.func @_loss_kernel(%arg0: memref<2xf32, #tpu.memory_space<smem>>, %arg1: memref<16x128xf32, #tpu.memory_space<vmem>>, %arg2: memref<8xf32, #tpu.memory_space<smem>>) attributes {dimension_semantics = [], scalar_prefetch = 0 : i64, scratch_operands = 0 : i64, tpu.core_type = #tpu.core_type<tc>} {
    %c0 = arith.constant 0 : index
    %c0_0 = arith.constant 0 : index
    %0 = vector.load %arg1[%c0, %c0_0] : memref<16x128xf32, #tpu.memory_space<vmem>>, vector<16x128xf32>
    %1 = tpu.iota {dimensions = array<i32: 1>} : vector<1x128xi32>
    %c2_i32 = arith.constant 2 : i32
    %2 = vector.broadcast %c2_i32 : i32 to vector<1x128xi32>
    %3 = arith.cmpi sge, %1, %2 : vector<1x128xi32>
    %c4_i32 = arith.constant 4 : i32
    %4 = vector.broadcast %c4_i32 : i32 to vector<1x128xi32>
    %5 = arith.cmpi slt, %1, %4 : vector<1x128xi32>
    %6 = arith.andi %3, %5 : vector<1x128xi1>
    %c4_i32_1 = arith.constant 4 : i32
    %7 = vector.broadcast %c4_i32_1 : i32 to vector<1x128xi32>
    %8 = arith.cmpi slt, %1, %7 : vector<1x128xi32>
    %c4_i32_2 = arith.constant 4 : i32
    %9 = vector.broadcast %c4_i32_2 : i32 to vector<1x128xi32>
    %10 = arith.cmpi sge, %1, %9 : vector<1x128xi32>
    %c8_i32 = arith.constant 8 : i32
    %11 = vector.broadcast %c8_i32 : i32 to vector<1x128xi32>
    %12 = arith.cmpi slt, %1, %11 : vector<1x128xi32>
    %13 = arith.andi %10, %12 : vector<1x128xi1>
    %c8_i32_3 = arith.constant 8 : i32
    %14 = vector.broadcast %c8_i32_3 : i32 to vector<1x128xi32>
    %15 = arith.cmpi sge, %1, %14 : vector<1x128xi32>
    %c9_i32 = arith.constant 9 : i32
    %16 = vector.broadcast %c9_i32 : i32 to vector<1x128xi32>
    %17 = arith.cmpi slt, %1, %16 : vector<1x128xi32>
    %18 = arith.andi %15, %17 : vector<1x128xi1>
    %c9_i32_4 = arith.constant 9 : i32
    %19 = vector.broadcast %c9_i32_4 : i32 to vector<1x128xi32>
    %20 = arith.cmpi sge, %1, %19 : vector<1x128xi32>
    %c21_i32 = arith.constant 21 : i32
    %21 = vector.broadcast %c21_i32 : i32 to vector<1x128xi32>
    %22 = arith.cmpi slt, %1, %21 : vector<1x128xi32>
    %23 = arith.andi %20, %22 : vector<1x128xi1>
    %cst = arith.constant 1.000000e+00 : f32
    %24 = vector.shape_cast %6 : vector<1x128xi1> to vector<1x128xi1>
    %25 = vector.broadcast %24 : vector<1x128xi1> to vector<16x128xi1>
    %26 = vector.broadcast %cst : f32 to vector<16x128xf32>
    %27 = arith.select %25, %0, %26 : vector<16x128xi1>, vector<16x128xf32>
    %28 = math.sqrt %27 : vector<16x128xf32>
    %29 = vector.shape_cast %6 : vector<1x128xi1> to vector<1x128xi1>
    %30 = vector.broadcast %29 : vector<1x128xi1> to vector<16x128xi1>
    %31 = arith.select %30, %28, %0 : vector<16x128xi1>, vector<16x128xf32>
    %32 = vector.extract_strided_slice %31 {offsets = [0, 0], sizes = [8, 128], strides = [1, 1]} : vector<16x128xf32> to vector<8x128xf32>
    %33 = vector.extract_strided_slice %31 {offsets = [8, 0], sizes = [8, 128], strides = [1, 1]} : vector<16x128xf32> to vector<8x128xf32>
    %34 = arith.subf %32, %33 : vector<8x128xf32>
    %35 = arith.mulf %34, %34 : vector<8x128xf32>
    %cst_5 = arith.constant dense<0.000000e+00> : vector<128xf32>
    %36 = vector.multi_reduction <add>, %35, %cst_5 [0] : vector<8x128xf32> to vector<128xf32>
    %37 = vector.shape_cast %36 : vector<128xf32> to vector<1x128xf32>
    %cst_6 = arith.constant 0.000000e+00 : f32
    %38 = vector.broadcast %cst_6 : f32 to vector<1x128xf32>
    %39 = arith.select %8, %37, %38 : vector<1x128xi1>, vector<1x128xf32>
    %40 = vector.shape_cast %39 : vector<1x128xf32> to vector<1x1x128xf32>
    %cst_7 = arith.constant dense<0.000000e+00> : vector<1xf32>
    %41 = vector.multi_reduction <add>, %40, %cst_7 [1, 2] : vector<1x1x128xf32> to vector<1xf32>
    %42 = vector.shape_cast %41 : vector<1xf32> to vector<1x1x1xf32>
    %43 = vector.extract %42[0, 0, 0] : f32 from vector<1x1x1xf32>
    %cst_8 = arith.constant 0.000000e+00 : f32
    %44 = vector.broadcast %cst_8 : f32 to vector<1x128xf32>
    %45 = arith.select %13, %37, %44 : vector<1x128xi1>, vector<1x128xf32>
    %46 = vector.shape_cast %45 : vector<1x128xf32> to vector<1x1x128xf32>
    %cst_9 = arith.constant dense<0.000000e+00> : vector<1xf32>
    %47 = vector.multi_reduction <add>, %46, %cst_9 [1, 2] : vector<1x1x128xf32> to vector<1xf32>
    %48 = vector.shape_cast %47 : vector<1xf32> to vector<1x1x1xf32>
    %49 = vector.extract %48[0, 0, 0] : f32 from vector<1x1x1xf32>
    %cst_10 = arith.constant 0.000000e+00 : f32
    %50 = vector.broadcast %cst_10 : f32 to vector<1x128xf32>
    %51 = arith.select %18, %37, %50 : vector<1x128xi1>, vector<1x128xf32>
    %52 = vector.shape_cast %51 : vector<1x128xf32> to vector<1x1x128xf32>
    %cst_11 = arith.constant dense<0.000000e+00> : vector<1xf32>
    %53 = vector.multi_reduction <add>, %52, %cst_11 [1, 2] : vector<1x1x128xf32> to vector<1xf32>
    %54 = vector.shape_cast %53 : vector<1xf32> to vector<1x1x1xf32>
    %55 = vector.extract %54[0, 0, 0] : f32 from vector<1x1x1xf32>
    %cst_12 = arith.constant 0.000000e+00 : f32
    %56 = vector.broadcast %cst_12 : f32 to vector<1x128xf32>
    %57 = arith.select %23, %37, %56 : vector<1x128xi1>, vector<1x128xf32>
    %58 = vector.shape_cast %57 : vector<1x128xf32> to vector<1x1x128xf32>
    %cst_13 = arith.constant dense<0.000000e+00> : vector<1xf32>
    %59 = vector.multi_reduction <add>, %58, %cst_13 [1, 2] : vector<1x1x128xf32> to vector<1xf32>
    %60 = vector.shape_cast %59 : vector<1xf32> to vector<1x1x1xf32>
    %61 = vector.extract %60[0, 0, 0] : f32 from vector<1x1x1xf32>
    %c0_14 = arith.constant 0 : index
    %62 = memref.load %arg0[%c0_14] : memref<2xf32, #tpu.memory_space<smem>>
    %c1 = arith.constant 1 : index
    %63 = memref.load %arg0[%c1] : memref<2xf32, #tpu.memory_space<smem>>
    %64 = arith.mulf %62, %43 : f32
    %65 = arith.mulf %63, %61 : f32
    %66 = arith.addf %64, %55 : f32
    %67 = arith.addf %66, %65 : f32
    %68 = arith.addf %67, %49 : f32
    %c0_15 = arith.constant 0 : index
    %69 = memref.load %arg2[%c0_15] : memref<8xf32, #tpu.memory_space<smem>>
    memref.store %68, %arg2[%c0_15] : memref<8xf32, #tpu.memory_space<smem>>
    %c1_16 = arith.constant 1 : index
    %70 = memref.load %arg2[%c1_16] : memref<8xf32, #tpu.memory_space<smem>>
    memref.store %64, %arg2[%c1_16] : memref<8xf32, #tpu.memory_space<smem>>
    %c2 = arith.constant 2 : index
    %71 = memref.load %arg2[%c2] : memref<8xf32, #tpu.memory_space<smem>>
    memref.store %55, %arg2[%c2] : memref<8xf32, #tpu.memory_space<smem>>
    %c3 = arith.constant 3 : index
    %72 = memref.load %arg2[%c3] : memref<8xf32, #tpu.memory_space<smem>>
    memref.store %65, %arg2[%c3] : memref<8xf32, #tpu.memory_space<smem>>
    %c4 = arith.constant 4 : index
    %73 = memref.load %arg2[%c4] : memref<8xf32, #tpu.memory_space<smem>>
    memref.store %49, %arg2[%c4] : memref<8xf32, #tpu.memory_space<smem>>
    %cst_17 = arith.constant 0.000000e+00 : f32
    %c5 = arith.constant 5 : index
    %74 = memref.load %arg2[%c5] : memref<8xf32, #tpu.memory_space<smem>>
    memref.store %cst_17, %arg2[%c5] : memref<8xf32, #tpu.memory_space<smem>>
    %cst_18 = arith.constant 0.000000e+00 : f32
    %c6 = arith.constant 6 : index
    %75 = memref.load %arg2[%c6] : memref<8xf32, #tpu.memory_space<smem>>
    memref.store %cst_18, %arg2[%c6] : memref<8xf32, #tpu.memory_space<smem>>
    %cst_19 = arith.constant 0.000000e+00 : f32
    %c7 = arith.constant 7 : index
    %76 = memref.load %arg2[%c7] : memref<8xf32, #tpu.memory_space<smem>>
    memref.store %cst_19, %arg2[%c7] : memref<8xf32, #tpu.memory_space<smem>>
    return
  }
}

</mosaic_0001>

<bundles_post_ra>
// kernel: yolo_loss.1
= control target key start
LH: loop header
LB: loop body
LE: loop exit
PB: predicated region body
PF: predicated region fallthrough
CT: control target
= control target key end

     0   :  { %7 = vsyncpa [#allocation3], 0  ;;  %s241_s0 = inlined_call_operand.vmem [shape: f32[2], index: 0, kind: input, shape index: {}]   ;;  %s242_s1 = inlined_call_operand.vmem [shape: f32[16,128], index: 1, kind: input, shape index: {}]   ;;  %s243_s2 = inlined_call_operand.vmem [shape: f32[8], index: 2, kind: output, shape index: {}]  }
   0x1   :  { %8 = vsyncpa [#allocation4], 0  ;;  %s15_s11 = sshll.u32 %s241_s0, 4  ;;  %s16_s11 = int_to_ptr.vmem [resolvable:$true] %s15_s11 }
   0x2   :  { %s169_s12 = scalar_lea.vmem %s16_s11, 16  ;;  %p174_p1 = scmp.lt.s32.totalorder %s16_s11, %s16_s11 }
   0x3   :  { %p170_p0 = scmp.ne.s32.totalorder %s16_s11, %s169_s12  ;;  %p175_p2 = scmp.lt.s32.totalorder %s169_s12, %s169_s12 }
   0x5   :  { %p176_p3 = por %p175_p2, %p174_p1 }
   0x7   :  { %p177_p4 = pnand %p176_p3, %p170_p0 }
   0x9   :  { %180 = shalt.err (!%p177_p4)
}
   0xa   :  { %s197_s13 = smov [#allocation2]  }
   0xb   :  { %18 = dma.vmem_to_smem %s16_s11, 16, %s197_s13, [#allocation3]  }
   0xc   :  { %193 = dma.done.wait [#allocation3], 16  }
   0xd   :  { %194 = vsyncadd [#allocation3], 4294967280 }
   0xe   :  { %24 = sfence }
   0xf   :  { %v27_v0 = vlaneseq  ;;  %v25_v2 = vld [vmem:[%s242_s1] sm:$0xff]  ;;  %v26_v3 = vld [vmem:[%s242_s1 + $0x8] sm:$0xff]  ;;  %s198_s1 = smov 0.0   ;;  %s114_s17 = sld [smem:[#allocation2]] }
  0x10   :  { %132 = sst [smem:[#allocation5 + $0x5]] %s198_s1  ;;  %s153_s18 = sld [smem:[#allocation2 + $0x1]] }
  0x11   :  { %v28_v1 = vand.u32 127, %v27_v0  ;;  %134 = sst [smem:[#allocation5 + $0x6]] %s198_s1  ;;  %s143_s24 = sshll.u32 %s243_s2, 4  ;;  %s144_s24 = int_to_ptr.vmem [resolvable:$true] %s143_s24 }
  0x12   :  { %136 = sst [smem:[#allocation5 + $0x7]] %s198_s1  ;;  %s181_s3 = scalar_lea.vmem %s144_s24, 16 }
  0x13   :  { %vm29_vm0 = vcmp.ge.s32.totalorder %v28_v1, 2  ;;  %vm30_vm1 = vcmp.lt.s32.totalorder %v28_v1, 4  ;;  %vm35_vm7 = vcmp.ge.s32.totalorder %v28_v1, 8  ;;  %vm36_vm8 = vcmp.lt.s32.totalorder %v28_v1, 9  ;;  %p182_p5 = scmp.ne.s32.totalorder %s144_s24, %s181_s3  ;;  %p186_p6 = scmp.lt.s32.totalorder %s144_s24, %s144_s24 }
  0x14   :  { %vm225_vm2 = vmand %vm29_vm0, %vm30_vm1  ;;  %vm38_vm9 = vcmp.ge.s32.totalorder %v28_v1, 9  ;;  %vm39_vm10 = vcmp.lt.s32.totalorder %v28_v1, 21  ;;  %vm32_vm11 = vcmp.ge.s32.totalorder %v28_v1, 4  ;;  %vm33_vm12 = vcmp.lt.s32.totalorder %v28_v1, 8  ;;  %p187_p7 = scmp.lt.s32.totalorder %s181_s3, %s181_s3 }
  0x15   :  { %v43_v5 = vsel %vm225_vm2, %v25_v2, 1.0  ;;  %v44_v6 = vsel %vm225_vm2, %v26_v3, 1.0  ;;  %vm37_vm13 = vmand %vm35_vm7, %vm36_vm8  ;;  %vm70_vm0 = vcmask 1040384  }
  0x16   :  { %165 = vrsqrt.f32 %v43_v5  ;;  %vm47_vm3 = vcmp.eq.f32.partialorder %v43_v5, inf  ;;  %v50_v8 = vand.u32 2147483648, %v43_v5  ;;  %vm49_vm4 = vcmp.eq.f32.partialorder %v43_v5, 0.0  ;;  %vm40_vm14 = vmand %vm38_vm9, %vm39_vm10  ;;  %p188_p8 = por %p187_p7, %p186_p6 }
  0x17   :  { %167 = vrsqrt.f32 %v44_v6  ;;  %vm54_vm5 = vcmp.eq.f32.partialorder %v44_v6, inf  ;;  %v57_v11 = vand.u32 2147483648, %v44_v6  ;;  %vm56_vm6 = vcmp.eq.f32.partialorder %v44_v6, 0.0  ;;  %vm34_vm15 = vmand %vm32_vm11, %vm33_vm12 }
  0x18   :  { %p189_p9 = pnand %p188_p8, %p182_p5 }
  0x20   :  { %v166_v7 = vpop.eup %165 }
  0x21   :  { %v168_v9 = vpop.eup %167  ;;  %v46_v10 = vmul.f32 %v166_v7, %v43_v5 }
  0x22   :  { %v53_v12 = vmul.f32 %v168_v9, %v44_v6 }
  0x23   :  { %v48_v13 = vsel %vm47_vm3, %v43_v5, %v46_v10 }
  0x24   :  { %v51_v14 = vsel %vm49_vm4, %v50_v8, %v48_v13  ;;  %v55_v15 = vsel %vm54_vm5, %v44_v6, %v53_v12 }
  0x25   :  { %v58_v16 = vsel %vm56_vm6, %v57_v11, %v55_v15  ;;  %v59_v17 = vsel %vm225_vm2, %v51_v14, %v25_v2 }
  0x26   :  { %v60_v18 = vsel %vm225_vm2, %v58_v16, %v26_v3 }
  0x27   :  { %v61_v19 = vsub.f32 %v59_v17, %v60_v18 }
  0x29   :  { %v62_v20 = vmul.f32 %v61_v19, %v61_v19 }
  0x2b   :  { %v63_v21 = vrot.slane %v62_v20, 4 }
  0x2d   :  { %v64_v22 = vadd.f32 %v63_v21, %v62_v20 }
  0x2f   :  { %v65_v23 = vrot.slane %v64_v22, 2 }
  0x31   :  { %v66_v24 = vadd.f32 %v65_v23, %v64_v22 }
  0x33   :  { %v67_v25 = vrot.slane %v66_v24, 1 }
  0x35   :  { %v68_v26 = vadd.f32 %v67_v25, %v66_v24 }
  0x37   :  { %v92_v27 = vsel %vm37_vm13, %v68_v26, 0.0  ;;  %v69_v28 = vsel %vm30_vm1, %v68_v26, 0.0  ;;  %v103_v29 = vsel %vm40_vm14, %v68_v26, 0.0  ;;  %v81_v30 = vsel %vm34_vm15, %v68_v26, 0.0 }
  0x38   :  { %v93_v31 = vsel %vm70_vm0, %v92_v27, 0.0  ;;  %v71_v32 = vsel %vm70_vm0, %v69_v28, 0.0  ;;  %v104_v33 = vsel %vm70_vm0, %v103_v29, 0.0  ;;  %v82_v34 = vsel %vm70_vm0, %v81_v30, 0.0 }
  0x39   :  { %94 = vadd.xlane.f32.xlu1 %v93_v31  ;;  %72 = vadd.xlane.f32.xlu0 %v71_v32 }
  0x3d   :  { %105 = vadd.xlane.f32.xlu1 %v104_v33  ;;  %83 = vadd.xlane.f32.xlu0 %v82_v34 }
  0xc6   :  { %v95_v35 = vpop.xlane.xlu1 %94  ;;  %v73_v36 = vpop.xlane.xlu0 %72 }
  0xc7   :  { %v96_v37 = vrot.slane %v95_v35, 4  ;;  %v74_v38 = vrot.slane %v73_v36, 4 }
  0xc9   :  { %v97_v39 = vadd.f32 %v96_v37, %v95_v35  ;;  %v75_v40 = vadd.f32 %v74_v38, %v73_v36 }
  0xca   :  { %v106_v41 = vpop.xlane.xlu1 %105  ;;  %v84_v42 = vpop.xlane.xlu0 %83 }
  0xcb   :  { %v98_v43 = vrot.slane %v97_v39, 2  ;;  %v76_v44 = vrot.slane %v75_v40, 2  ;;  %v107_v45 = vrot.slane %v106_v41, 4  ;;  %v85_v46 = vrot.slane %v84_v42, 4 }
  0xcd   :  { %v108_v47 = vadd.f32 %v107_v45, %v106_v41  ;;  %v86_v48 = vadd.f32 %v85_v46, %v84_v42  ;;  %v77_v49 = vadd.f32 %v76_v44, %v75_v40  ;;  %v99_v50 = vadd.f32 %v98_v43, %v97_v39 }
  0xcf   :  { %v109_v51 = vrot.slane %v108_v47, 2  ;;  %v87_v52 = vrot.slane %v86_v48, 2  ;;  %v78_v53 = vrot.slane %v77_v49, 1  ;;  %v100_v57 = vrot.slane %v99_v50, 1 }
  0xd1   :  { %v110_v54 = vadd.f32 %v109_v51, %v108_v47  ;;  %v88_v55 = vadd.f32 %v87_v52, %v86_v48  ;;  %v79_v56 = vadd.f32 %v78_v53, %v77_v49  ;;  %v101_v62 = vadd.f32 %v100_v57, %v99_v50 }
  0xd3   :  { %154 = vpush %v79_v56  ;;  %v89_v58 = vrot.slane %v88_v55, 1  ;;  %v111_v59 = vrot.slane %v110_v54, 1 }
  0xd5   :  { %v90_v60 = vadd.f32 %v89_v58, %v88_v55  ;;  %v112_v61 = vadd.f32 %v111_v59, %v110_v54 }
  0xd7   :  { %156 = vpush %v90_v60 }
  0xd8   :  { %158 = vpush %v101_v62 }
  0xd9   :  { %160 = vpush %v112_v61 }
 0x104   :  { %s155_s19 = spop %154 }
 0x105   :  { %s116_s20 = smul.f32 %s155_s19, %s114_s17 }
 0x107   :  { %124 = sst [smem:[#allocation5 + $0x1]] %s116_s20 }
 0x108   :  { %s157_s21 = spop %156 }
 0x109   :  { %130 = sst [smem:[#allocation5 + $0x4]] %s157_s21  ;;  %s159_s25 = spop %158 }
 0x10a   :  { %s118_s26 = sadd.f32 %s159_s25, %s116_s20  ;;  %s161_s27 = spop %160 }
 0x10b   :  { %126 = sst [smem:[#allocation5 + $0x2]] %s159_s25  ;;  %s117_s28 = smul.f32 %s161_s27, %s153_s18 }
 0x10d   :  { %s119_s29 = sadd.f32 %s118_s26, %s117_s28 }
 0x10e   :  { %128 = sst [smem:[#allocation5 + $0x3]] %s117_s28 }
 0x10f   :  { %s120_s30 = sadd.f32 %s157_s21, %s119_s29 }
 0x111   :  { %122 = sst [smem:[#allocation5]] %s120_s30 }
 0x112   :  { %192 = shalt.err (!%p189_p9)
}
 0x113   :  { %s199_s4 = smov [#allocation5]  }
 0x114   :  { %146 = dma.smem_to_vmem %s199_s4, 16, %s144_s24, [#allocation4]  }
 0x115   :  { %195 = dma.done.wait [#allocation4], 16  }
 0x116   :  { %196 = vsyncadd [#allocation4], 4294967280 }
 0x117   :  { %150 = sfence }
 0x118   :  { %151 = vsyncpa [#allocation3], 1 }
 0x119   :  { %152 = vsyncpa [#allocation4], 1 }

</bundles_post_ra>
